<compile_context>
chip_gen: v7x
topology: tpu7x:2x2x1
jax: 0.10.0
libtpu: 0.0.40
codegen_flags: <defaults>
</compile_context>

<pallas_src>
import random

import numpy as np
import jax
import jax.numpy as jnp
from jax.experimental import pallas as pl
from jax.experimental.pallas import tpu as pltpu


def _round_up(x, m):
    return ((x + m - 1) // m) * m


# ----------------------------------------------------------------------------
# Pallas kernel: one (batch, T_out-tile) per grid step.
#   base_ref : SMEM (B, n_t) int32   first src row of this tile's window
#   ids_ref  : VMEM (TT, 1)  int32   absolute gather ids for this tile (-1 = zero row)
#   src_hbm  : ANY  (B, T_in, D)     source spectrogram (stays in HBM)
#   out_ref  : VMEM (TT, D)          gathered (time-stretched) rows, zero padded
#   win_ref  : VMEM (T_win, D)       scratch window of src rows
#   dma_sem  : DMA semaphore
# ----------------------------------------------------------------------------
def _gather_window_kernel(base_ref, ids_ref, src_hbm, out_ref, win_ref, dma_sem):
    b = pl.program_id(0)
    t = pl.program_id(1)
    base = base_ref[b, t]
    t_win = win_ref.shape[0]
    tt = out_ref.shape[0]

    # DMA only the window of src rows this tile can touch.
    cp = pltpu.make_async_copy(src_hbm.at[b, pl.ds(base, t_win), :], win_ref, dma_sem)
    cp.start()

    # Build the (TT, T_win) one-hot while the DMA is in flight.
    rel = ids_ref[...] - base                                   # (TT, 1); pad rows -> negative
    col = jax.lax.broadcasted_iota(jnp.int32, (tt, t_win), 1)   # window-local column index
    onehot = (col == rel).astype(jnp.float32)                   # exact 0/1 row-select matrix

    cp.wait()
    # out[t, :] = win[rel[t], :]   (exact one-hot gather on the MXU)
    out_ref[...] = jnp.dot(
        onehot, win_ref[...].astype(jnp.float32),
        preferred_element_type=jnp.float32,
    ).astype(out_ref.dtype)


def _window_params(ids_padded, t_in, tt):
    """Per-(batch, tile) window base (aligned down to 8) and static window length."""
    B, t_out_p = ids_padded.shape
    n_t = t_out_p // tt
    tiles = ids_padded.reshape(B, n_t, tt)
    valid = tiles >= 0
    has_valid = valid.any(axis=2)
    mins = np.where(valid, tiles, np.iinfo(np.int32).max).min(axis=2)
    mins = np.where(has_valid, mins, 0)
    maxs = np.where(valid, tiles, -1).max(axis=2)
    maxs = np.maximum(maxs, mins)

    base = (mins // 8) * 8                                   # sublane-aligned window start
    span = int((maxs - base + 1).max())                      # worst-case rows touched per tile
    t_win = int(min(t_in, _round_up(max(span, 1), 8)))
    t_win = max(t_win, 1)
    base = np.clip(base, 0, t_in - t_win).astype(np.int32)   # keep window inside src
    return base, t_win


def gather_rows_pallas(src, per_ids, *, tile_t=256):
    """src: (B, T_in, D) f32 device array; per_ids: list of B host int arrays.

    Returns (frames, new_lengths): frames (B, T_out, D) f32 with
    T_out = max(new_lengths, 1), zero padded past each sequence's new length.
    """
    B, T_in, D = src.shape
    new_lengths = [int(len(x)) for x in per_ids]
    T_out = max(max(new_lengths), 1)            # guard degenerate all-empty case

    # Output time tile (multiple of 8).  256 fills the 256x256 MXU on v6e/v7x;
    # use tile_t=128 on v5e.
    TT = min(_round_up(tile_t, 8), _round_up(T_out, 8))
    T_out_p = _round_up(T_out, TT)
    n_t = T_out_p // TT

    # -1 sentinel => zero (padding) row in the kernel's one-hot gather.
    ids_padded = np.full((B, T_out_p), -1, dtype=np.int32)
    for b, ids in enumerate(per_ids):
        if len(ids):
            ids_padded[b, : len(ids)] = np.asarray(ids, dtype=np.int32)
    base_tbl, T_win = _window_params(ids_padded, T_in, TT)

    ids_dev = jnp.asarray(ids_padded.reshape(B, T_out_p, 1))   # (B, T_out_p, 1) int32
    base_dev = jnp.asarray(base_tbl)                           # (B, n_t) int32 -> SMEM prefetch

    # Split batches (not tiles) across v7x's two TensorCores when possible.
    dims = ("parallel", "arbitrary") if B > 1 else ("parallel", "parallel")

    out = pl.pallas_call(
        _gather_window_kernel,
        out_shape=jax.ShapeDtypeStruct((B, T_out, D), jnp.float32),
        grid_spec=pltpu.PrefetchScalarGridSpec(
            num_scalar_prefetch=1,
            grid=(B, n_t),
            in_specs=[
                # tiny per-tile index block (TT, 1)
                pl.BlockSpec((None, TT, 1), lambda b, t, base: (b, t, 0)),
                # source spectrogram stays in HBM; windows are DMA'd manually
                pl.BlockSpec(memory_space=pl.ANY),
            ],
            out_specs=pl.BlockSpec((None, TT, D), lambda b, t, base: (b, t, 0)),
            scratch_shapes=[
                pltpu.VMEM((T_win, D), src.dtype),
                pltpu.SemaphoreType.DMA,
            ],
        ),
        compiler_params=pltpu.CompilerParams(dimension_semantics=dims),
    )(base_dev, ids_dev, src)
    return out, new_lengths


# ----------------------------------------------------------------------------
# Host-side replica of time_stretch_seq index construction (shapes are
# data-dependent / random, so this cannot live inside a static-shape kernel).
# ----------------------------------------------------------------------------
def _time_stretch_ids(time_len, w, low, high, rng):
    if time_len < 10 and low < 1.0:
        low = 1.0
    pieces = []
    for i in range(int(round(time_len / w))):
        s = rng.uniform(low, high) * min(w, time_len - w * i)
        e = min(time_len, w * (i + 1))
        r = np.linspace(w * i, e - 1, int(s))     # == torch.linspace
        r = np.round(r).astype(np.int32)          # round-half-even, same as torch.round
        pieces.append(r)
    if not pieces:
        return np.zeros((0,), np.int32)
    return np.concatenate(pieces, axis=0)


class TimeStretch:
    """JAX/Pallas equivalent of the PyTorch TimeStretch module (no learned params)."""

    def __init__(self, rate, w, low, high, seed=0, tile_t=256):
        if w < 1:
            raise ValueError("w must be greater than 1")
        self.rate = rate
        self.w = w
        self.low = low
        self.high = high
        self.tile_t = tile_t
        self._rng = random.Random(seed)   # deterministic
        self._last_ids = None             # kept for verification

    def forward(self, batch):
        net_input = batch["net_input"]
        src_tokens = jnp.asarray(net_input["src_tokens"], dtype=jnp.float32)  # stays on device
        src_lengths_host = np.asarray(net_input["src_lengths"])               # tiny D2H copy only
        B = src_tokens.shape[0]

        per_ids = []
        for b in range(B):
            L = int(src_lengths_host[b])
            if self._rng.random() < self.rate:
                ids = _time_stretch_ids(L, self.w, self.low, self.high, self._rng)
            else:
                ids = np.arange(L, dtype=np.int32)
            per_ids.append(ids)

        frames, new_lengths = gather_rows_pallas(src_tokens, per_ids, tile_t=self.tile_t)

        # Shallow-copy the dict structure; the spectrogram itself never round-trips
        # through the host.
        new_batch = dict(batch)
        new_batch["net_input"] = dict(net_input)
        new_batch["net_input"]["src_tokens"] = frames
        new_batch["net_input"]["src_lengths"] = jnp.asarray(new_lengths, dtype=jnp.int32)
        self._last_ids = per_ids
        return new_batch


if __name__ == "__main__":
    def _check(ts, batch):
        new_batch = ts.forward(batch)
        frames = jax.block_until_ready(new_batch["net_input"]["src_tokens"])
        new_lengths = np.asarray(new_batch["net_input"]["src_lengths"])

        src_np = np.asarray(batch["net_input"]["src_tokens"], dtype=np.float32)
        B, _, D = src_np.shape
        T_out = frames.shape[1]
        expected = np.zeros((B, T_out, D), np.float32)
        for b, ids in enumerate(ts._last_ids):
            if len(ids):
                expected[b, : len(ids), :] = src_np[b][np.asarray(ids), :]
        np.testing.assert_allclose(np.asarray(frames), expected, rtol=1e-5, atol=1e-5)
        assert list(new_lengths) == [len(ids) for ids in ts._last_ids]

    key = jax.random.PRNGKey(0)
    k1, k2 = jax.random.split(key)

    # Small test consistent with the module (B=2 utterances, 16 frames, 16 mel bins).
    src_small = jax.random.normal(k1, (2, 16, 16), dtype=jnp.float32)
    batch_small = {"net_input": {"src_tokens": src_small,
                                 "src_lengths": jnp.array([16, 12], dtype=jnp.int32)}}
    _check(TimeStretch(rate=0.85, w=4, low=0.8, high=1.25, seed=0), batch_small)

    # Slightly longer test: multiple output tiles, nonzero window bases, partial
    # last output block.
    src_long = jax.random.normal(k2, (2, 96, 24), dtype=jnp.float32)
    batch_long = {"net_input": {"src_tokens": src_long,
                                "src_lengths": jnp.array([96, 70], dtype=jnp.int32)}}
    _check(TimeStretch(rate=1.0, w=4, low=0.8, high=1.25, seed=1, tile_t=32), batch_long)

    print("KERNEL_OK")
</pallas_src>

<mosaic_0001>
module attributes {stable_mosaic.version = 11 : i64} {
  func.func @_gather_window_kernel(%arg0: i32, %arg1: i32, %arg2: memref<2x1xi32, #tpu.memory_space<smem>>, %arg3: memref<1x16x1xi32, #tpu.memory_space<vmem>>, %arg4: memref<2x16x16xf32, #tpu.memory_space<any>>, %arg5: memref<1x16x16xf32, #tpu.memory_space<vmem>>, %arg6: memref<16x16xf32, #tpu.memory_space<vmem>>, %arg7: memref<!tpu.dma_semaphore, #tpu.memory_space<semaphore_mem>>) attributes {dimension_semantics = [#tpu.dimension_semantics<parallel>, #tpu.dimension_semantics<arbitrary>], iteration_bounds = array<i64: 2, 1>, scalar_prefetch = 1 : i64, scratch_operands = 2 : i64, tpu.core_type = #tpu.core_type<tc>, window_params = [{transform_indices = @transform_0, window_bounds = array<i64: 1, 16, 1>}, {}, {transform_indices = @transform_2, window_bounds = array<i64: 1, 16, 16>}]} {
    %0 = arith.index_cast %arg0 : i32 to index
    %1 = arith.index_cast %arg1 : i32 to index
    %2 = memref.load %arg2[%0, %1] : memref<2x1xi32, #tpu.memory_space<smem>>
    %c0_i32 = arith.constant 0 : i32
    %3 = tpu.memref_slice %arg4[%arg0, %2, %c0_i32] : memref<2x16x16xf32, #tpu.memory_space<any>> -> memref<1x16x16xf32, #tpu.memory_space<any>>
    %4 = tpu.memref_squeeze %3 : memref<1x16x16xf32, #tpu.memory_space<any>> -> memref<16x16xf32, #tpu.memory_space<any>>
    tpu.enqueue_dma source(%4 : memref<16x16xf32, #tpu.memory_space<any>>) target(%arg6 : memref<16x16xf32, #tpu.memory_space<vmem>>) target_semaphore(%arg7 : memref<!tpu.dma_semaphore, #tpu.memory_space<semaphore_mem>>)
    %c0 = arith.constant 0 : index
    %c0_0 = arith.constant 0 : index
    %c0_1 = arith.constant 0 : index
    %5 = vector.load %arg3[%c0, %c0_0, %c0_1] : memref<1x16x1xi32, #tpu.memory_space<vmem>>, vector<1x16x1xi32>
    %6 = vector.shape_cast %5 : vector<1x16x1xi32> to vector<16x1xi32>
    %7 = vector.broadcast %2 : i32 to vector<16x1xi32>
    %8 = arith.subi %6, %7 : vector<16x1xi32>
    %9 = tpu.iota {dimensions = array<i32: 1>} : vector<16x16xi32>
    %10 = vector.broadcast %8 : vector<16x1xi32> to vector<16x16xi32>
    %11 = arith.cmpi eq, %9, %10 : vector<16x16xi32>
    %12 = arith.extui %11 : vector<16x16xi1> to vector<16x16xi32>
    %13 = arith.sitofp %12 : vector<16x16xi32> to vector<16x16xf32>
    %c0_i32_2 = arith.constant 0 : i32
    %14 = tpu.memref_slice %arg4[%arg0, %2, %c0_i32_2] : memref<2x16x16xf32, #tpu.memory_space<any>> -> memref<1x16x16xf32, #tpu.memory_space<any>>
    %15 = tpu.memref_squeeze %14 : memref<1x16x16xf32, #tpu.memory_space<any>> -> memref<16x16xf32, #tpu.memory_space<any>>
    tpu.wait_dma2 semaphore(%arg7 : memref<!tpu.dma_semaphore, #tpu.memory_space<semaphore_mem>>) src(%15 : memref<16x16xf32, #tpu.memory_space<any>>) dst(%arg6 : memref<16x16xf32, #tpu.memory_space<vmem>>)
    %c0_3 = arith.constant 0 : index
    %c0_4 = arith.constant 0 : index
    %16 = vector.load %arg6[%c0_3, %c0_4] : memref<16x16xf32, #tpu.memory_space<vmem>>, vector<16x16xf32>
    %cst = arith.constant dense<0.000000e+00> : vector<16x16xf32>
    %17 = tpu.matmul %13, %16, %cst {dimension_numbers = #tpu.dot_dimension_numbers<[1], [0], [0], [1], [0, 0, 1, 1], [], []>} : vector<16x16xf32>, vector<16x16xf32>, vector<16x16xf32> -> vector<16x16xf32>
    %c0_5 = arith.constant 0 : index
    %c0_6 = arith.constant 0 : index
    %c0_7 = arith.constant 0 : index
    %18 = vector.load %arg5[%c0_5, %c0_6, %c0_7] : memref<1x16x16xf32, #tpu.memory_space<vmem>>, vector<1x16x16xf32>
    %19 = vector.shape_cast %18 : vector<1x16x16xf32> to vector<16x16xf32>
    %20 = vector.shape_cast %17 : vector<16x16xf32> to vector<1x16x16xf32>
    tpu.vector_store %arg5[%c0_5, %c0_6, %c0_7], %20 {strides = array<i32>} : memref<1x16x16xf32, #tpu.memory_space<vmem>>, vector<1x16x16xf32>,
    return
  }
  func.func @transform_0(%arg0: i32, %arg1: i32, %arg2: memref<2x1xi32, #tpu.memory_space<smem>>) -> (i32, i32, i32) {
    %c0_i32 = arith.constant 0 : i32
    %c0_i32_0 = arith.constant 0 : i32
    return %arg0, %arg1, %c0_i32 : i32, i32, i32
  }
  func.func @transform_2(%arg0: i32, %arg1: i32, %arg2: memref<2x1xi32, #tpu.memory_space<smem>>) -> (i32, i32, i32) {
    %c0_i32 = arith.constant 0 : i32
    %c0_i32_0 = arith.constant 0 : i32
    return %arg0, %arg1, %c0_i32 : i32, i32, i32
  }
}

</mosaic_0001>

<bundles_post_ra>
// kernel: tpu_custom_call.1
= control target key start
LH: loop header
LB: loop body
LE: loop exit
PB: predicated region body
PF: predicated region fallthrough
CT: control target
= control target key end

     0   :  { %s600_s0 = inlined_call_operand.vmem [shape: s32[2,1], index: 0, kind: input, shape index: {}]   ;;  %s601_s1 = inlined_call_operand.vmem [shape: s32[2,16,1], index: 1, kind: input, shape index: {}]   ;;  %s602_s2 = inlined_call_operand.vmem [shape: f32[2,16,16], index: 2, kind: input, shape index: {}]   ;;  %s603_s3 = inlined_call_operand.vmem [shape: f32[2,14,16], index: 3, kind: output, shape index: {}]  }
   0x1   :  { %s8_s14 = sshll.u32 %s600_s0, 4  ;;  %s9_s14 = int_to_ptr.vmem [resolvable:$true] %s8_s14 }
   0x2   :  { %s494_s15 = scalar_lea.vmem %s9_s14, 32  ;;  %p499_p1 = scmp.lt.s32.totalorder %s9_s14, %s9_s14 }
   0x3   :  { %p495_p0 = scmp.ne.s32.totalorder %s9_s14, %s494_s15  ;;  %p500_p2 = scmp.lt.s32.totalorder %s494_s15, %s494_s15 }
   0x5   :  { %p501_p3 = por %p500_p2, %p499_p1 }
   0x7   :  { %p502_p4 = pnand %p501_p3, %p495_p0 }
   0x9   :  { %505 = shalt.err (!%p502_p4)  }
   0xa   :  { %s534_s16 = smov [#allocation5]  }
   0xb   :  { %11 = dma.vmem_to_smem %s9_s14, 32, %s534_s16, [#allocation4] }
   0xc   :  { %518 = dma.done.wait [#allocation4], 32 }
   0xd   :  { %519 = vsyncadd [#allocation4], 4294967264 }
   0xe   :  { %13 = sfence }
   0xf   :  { %s560_s17 = smov 0   ;;  %s562_s18 = smov 0  }
  0x10   :  { %s564_s19 = smov 0  }
  0x11 LB: > { %s31_s0 = sadd.s32 1, %s528_s18  ;;  %p435_p5 = scmp.ge.s32.totalorder %s532_s19, 1  ;;  %s532_s19 = sphi %s564_s19, %s19_s19   ;;  %s528_s18 = sphi %s562_s18, %s605_s18   ;;  %s524_s17 = sphi %s560_s17, %s604_s17  }
  0x12   : > { %p33_p6 = scmp.ge.s32.totalorder %s31_s0, 2  ;;  %p116_p7 = scmp.lt.s32.totalorder %s532_s19, 3 }
  0x14   : > { %s607_s0 = smov (%p33_p6, %s31_s0), 0  ;;  %p117_p8 = pnand %p435_p5, %p116_p7 }
  0x15   : > { %p145_p9 = scmp.lt.s32.totalorder (!%p117_p8), %s524_s17, 1  ;;  %s440_s20 = sshll.u32 (!%p117_p8), %s524_s17, 7 }
  0x16   : > { %120 = sbr.rel (%p117_p8) target bundleno = 389 (0x185), region = 24  ;;  %s171_s21 = sld [smem:[#allocation5 + %s440_s20]] (!%p117_p8) }
  0x17   : > { %s441_s24 = sshll.u32 (!%p117_p8), %s524_s17, 4 }
  0x1c   : > { %s173_s4 = sadd.s32 (!%p117_p8), %s441_s24, %s171_s21  ;;  %v221_v4 = vstv (!%p117_p8), %s171_s21 }
  0x1d   : > { %s146_s22 = scalar_select %p145_p9, %s524_s17, 1 }
  0x1e   : > { %s174_s7 = scalar_lea.vmem %s602_s2, %s173_s4 }
  0x1f   : > { %s449_s23 = sshll.u32 %s146_s22, 4  ;;  %v207_v0 = vld [vmem:[%s174_s7] sm:$0xff]  ;;  %v209_v1 = vld [vmem:[%s174_s7 + $0x8] sm:$0xff] }
  0x20   : > { %s152_s27 = scalar_lea.vmem %s601_s1, %s449_s23  ;;  %s584_s30 = scalar_lea.vmem %s603_s3, %s449_s23 }
  0x21   : > { %v219_v2 = vld [vmem:[%s152_s27] sm:$0xff]  ;;  %v220_v3 = vld [vmem:[%s152_s27 + $0x8] sm:$0xff] }
  0x22   : > { %218 = vsyncadd [#allocation3], 256  ;;  %v535_v5 = vmov 0   ;;  %v222_v6 = vsub.s32 %v219_v2, %v221_v4  ;;  %v223_v7 = vsub.s32 %v220_v3, %v221_v4  ;;  %v224_v8 = vlaneseq }
  0x23   : > { %493 = vset.pattern.permute.xlu0 %v535_v5  ;;  %v536_v11 = vmov 0.0   ;;  %v462_v15 = vpack.c.bf16 %v209_v1, %v207_v0  ;;  %vm243_vm2 = vcmask 130048  }
  0x24   : > { %227 = vperm.xlu0 %493, %v222_v6   ;;  %v225_v9 = vand.u32 127, %v224_v8 }
  0x28   : > { %230 = vperm.xlu0 %493, %v223_v7  }
  0xa3   : > { %v228_v10 = vpop.permute.xlu0 %227 }
  0xa4   : > { %vm232_vm0 = vcmp.eq.s32.totalorder %v225_v9, %v228_v10 }
  0xa5   : > { %v442_v12 = vsel %vm232_vm0, 1.0, %v536_v11 }
  0xa7   : > { %v231_v13 = vpop.permute.xlu0 %230 }
  0xa8   : > { %vm233_vm1 = vcmp.eq.s32.totalorder %v225_v9, %v231_v13 }
  0xa9   : > { %v443_v14 = vsel %vm233_vm1, 1.0, %v536_v11 }
  0xaa   : > { %520 = dma.done.wait [#allocation3], 256 }
  0xab   : > { %521 = vsyncadd [#allocation3], 4294967040  ;;  %459 = vmatprep.mubr.msk.f32.mxu0 %vm243_vm2, %v442_v12  ;;  %463 = vmatprep.subr.bf16.mxu0 %v462_v15 }
  0xac   : > { %465 = vmatpush3.bf16.msra.mxu0 %v462_v15 }
  0xaf   : > { %460 = vmatmul.mubr.msk.f32.vlgmr.msra.gmra.mrb[0].mxu0 %vm243_vm2, %v443_v14 }
 0x182   : > { %v461_v16 = vpop.f32.mrb[0].mxu0 }
 0x183   : > { %326 = vst.msk [vmem:[%s584_s30 + $0x8] sm:$0xff] %vm243_vm2, %v461_v16  ;;  %v316_v17 = vpop.f32.mrb[1].mxu0 }
 0x184   : > { %325 = vst.msk [vmem:[%s584_s30] sm:$0xff] %vm243_vm2, %v316_v17 }
 0x185 PF: > { %s19_s19 = sadd.s32 1, %s532_s19   ;;  %s604_s17 = smov %s528_s18 }
 0x186   : > { %p16_p10 = scmp.ge.s32.totalorder %s19_s19, 4   ;;  %s605_s18 = smov %s607_s0 }
 0x188   :  { %18 = sbr.rel (!%p16_p10) target bundleno = 17 (0x11), region = 97 }
 0x18f   :  { %357 = vsyncmov [#allocation3] }
 0x192   :  { %s358_s8 = vpop.sfrf %357 }
 0x193   :  { %p448_p11 = scmp.ne.s32.totalorder %s358_s8, 0 }
 0x195   :  { %362 = shalt.err (%p448_p11)  }

</bundles_post_ra>
